<compile_context>
chip_gen: v5e
topology: v5e:2x2
jax: 0.10.0
libtpu: 0.0.40
codegen_flags: <defaults>
</compile_context>

<pallas_src>
import functools

import jax
import jax.numpy as jnp
from jax import lax
from jax.experimental import pallas as pl
from jax.experimental.pallas import tpu as pltpu


_EPS = 1e-12          # matches torch.nn.functional.normalize default eps
_OUT_LANES = 128      # lane-padded scalar output row -> unmasked vector store
_SUBLANE = 8
_LANE = 128
_TC_MAX = 512         # column-strip width for the gram blocks


def _round_up(x, m):
    return (x + m - 1) // m * m


# ----------------------------- kernel helpers ------------------------------ #
def _pack_scalars(*vals):
    """Pack scalars into lanes [0..k) of a (1, 128) f32 row (single vst)."""
    lane = lax.broadcasted_iota(jnp.int32, (1, _OUT_LANES), 1)
    row = jnp.zeros((1, _OUT_LANES), jnp.float32)
    for i, v in enumerate(vals):
        row = row + jnp.where(lane == i, v.astype(jnp.float32), 0.0)
    return row


def _ce_body(logits, labels):
    """Mean cross-entropy of [B, C] logits; labels is [B, 1] int32."""
    logits = logits.astype(jnp.float32)
    b, c = logits.shape
    m = jnp.max(logits, axis=-1, keepdims=True)
    lse = jnp.log(jnp.sum(jnp.exp(logits - m), axis=-1, keepdims=True)) + m
    col = lax.broadcasted_iota(jnp.int32, (b, c), 1)
    true_logit = jnp.sum(jnp.where(col == labels, logits, 0.0),
                         axis=-1, keepdims=True)
    return jnp.mean(lse - true_logit)


def _normalize_f32(x):
    """F.normalize(x, 2, -1) == x * rsqrt(max(||x||^2, eps^2))."""
    sq = jnp.sum(x * x, axis=-1, keepdims=True)
    return x * lax.rsqrt(jnp.maximum(sq, _EPS * _EPS))


def _infonce_body(z1s_ref, z1t_ref, z2s_ref, z2t_ref,
                  z1n_ref, z2n_ref, neg_top_ref, neg_bot_ref,
                  *, inv_temp, b_valid, b_pad):
    """InfoNCE over z1=[z1s;z1t], z2=[z2s;z2t] (each padded to b_pad rows/half).

    Uses the 2x2 block structure of cov = [[A,B],[B^T,C]]:
      neg(top row i) = rowsum(exp(A/T))_i + rowsum(exp(B/T))_i - exp(A_ii/T)
      neg(bot row j) = colsum(exp(B/T))_j + colsum(exp(C/T))_j - exp(C_jj/T)
    Padded (all-zero) rows contribute exp(0)=1 to every sum; removed
    analytically (pad_corr) and masked out of the mean.
    """
    m = 2 * b_pad                     # padded rows per z matrix
    n = 2 * b_valid                   # actual rows per z matrix
    n_pad = m - n
    dp = z1n_ref.shape[-1]
    dn = (((1,), (1,)), ((), ()))     # contract the feature dim directly
    ones_row = jnp.ones((1, dp), jnp.float32)

    # ---- phase 1: per-half f32 normalize -> bf16 scratch, f32 positives ----
    pos_sum = jnp.float32(0.0)
    for za_ref, zb_ref, row0 in ((z1s_ref, z2s_ref, 0),
                                 (z1t_ref, z2t_ref, b_pad)):
        na = _normalize_f32(za_ref[...].astype(jnp.float32))
        nb = _normalize_f32(zb_ref[...].astype(jnp.float32))
        pos_sum = pos_sum + jnp.sum(na * nb)          # padded rows are zero
        z1n_ref[row0:row0 + b_pad, :] = na.astype(jnp.bfloat16)
        z2n_ref[row0:row0 + b_pad, :] = nb.astype(jnp.bfloat16)

    # ---- phase 2: column-strip gram blocks (bf16 MXU, f32 accumulate) ------
    neg_top_ref[...] = jnp.zeros_like(neg_top_ref)

    def do_strip(c0, tc):
        z1a = z1n_ref[...]                              # [M, Dp] bf16
        z2a = z2n_ref[...]
        z1c = z1n_ref[c0:c0 + tc, :]                    # [tc, Dp] bf16
        z2c = z2n_ref[c0:c0 + tc, :]
        ea = jnp.exp(lax.dot_general(z1a, z1c, dn,
                                     preferred_element_type=jnp.float32)
                     * inv_temp)                        # [M, tc]
        eb = jnp.exp(lax.dot_general(z1a, z2c, dn,
                                     preferred_element_type=jnp.float32)
                     * inv_temp)
        ec = jnp.exp(lax.dot_general(z2a, z2c, dn,
                                     preferred_element_type=jnp.float32)
                     * inv_temp)
        # Exact bf16 diagonals of A / C for the rows whose diagonal falls in
        # this column strip (robust to bf16 rounding and all-zero rows).
        z1cf = z1c.astype(jnp.float32)
        z2cf = z2c.astype(jnp.float32)
        diag_a = jnp.sum(z1cf * z1cf, axis=-1, keepdims=True)          # [tc,1]
        diag_c = lax.dot_general(ones_row, z2cf * z2cf, dn,
                                 preferred_element_type=jnp.float32)   # [1,tc]

        neg_top_ref[...] += (jnp.sum(ea, axis=-1, keepdims=True)
                             + jnp.sum(eb, axis=-1, keepdims=True))
        neg_top_ref[c0:c0 + tc, :] -= jnp.exp(diag_a * inv_temp)
        neg_bot_ref[:, c0:c0 + tc] = (jnp.sum(eb, axis=0, keepdims=True)
                                      + jnp.sum(ec, axis=0, keepdims=True)
                                      - jnp.exp(diag_c * inv_temp))

    # Static unroll: realistic sizes give only a handful of strips.
    # TODO(synk): switch to an 'arbitrary' grid axis / fori_loop for huge M.
    for c0 in range(0, m, _TC_MAX):
        do_strip(c0, min(_TC_MAX, m - c0))

    # ---- phase 3: pad correction + masked mean ------------------------------
    pad_corr = jnp.float32(2.0 * n_pad)     # exp(0)=1 from each padded column
    neg_top = neg_top_ref[...] - pad_corr                               # [M,1]
    neg_bot = neg_bot_ref[...] - pad_corr                               # [1,M]

    row_ix = lax.broadcasted_iota(jnp.int32, (m, 1), 0)
    col_ix = lax.broadcasted_iota(jnp.int32, (1, m), 1)
    top_valid = jnp.where(row_ix >= b_pad, row_ix - b_pad, row_ix) < b_valid
    bot_valid = jnp.where(col_ix >= b_pad, col_ix - b_pad, col_ix) < b_valid

    tiny = jnp.float32(1e-30)
    log_top = jnp.where(top_valid, jnp.log(jnp.maximum(neg_top, tiny)), 0.0)
    log_bot = jnp.where(bot_valid, jnp.log(jnp.maximum(neg_bot, tiny)), 0.0)
    sum_log_neg = jnp.sum(log_top) + jnp.sum(log_bot)

    # -mean(log(pos/neg)) = (sum(log neg) - 2*sum(pos_logit)/T) / (2n)
    return (sum_log_neg - 2.0 * pos_sum * inv_temp) / (2.0 * n)


# -------------------------------- kernels ----------------------------------- #
def _fused_kernel(z1s_ref, z1t_ref, z2s_ref, z2t_ref, logits_ref, labels_ref,
                  out_ref, z1n_ref, z2n_ref, neg_top_ref, neg_bot_ref,
                  *, inv_temp, weight, b_valid, b_pad):
    cls_loss = _ce_body(logits_ref[...], labels_ref[...])
    contrast = _infonce_body(z1s_ref, z1t_ref, z2s_ref, z2t_ref,
                             z1n_ref, z2n_ref, neg_top_ref, neg_bot_ref,
                             inv_temp=inv_temp, b_valid=b_valid, b_pad=b_pad)
    total = cls_loss + weight * contrast
    out_ref[...] = _pack_scalars(cls_loss, contrast, total)


def _ce_only_kernel(logits_ref, labels_ref, out_ref):
    out_ref[...] = _pack_scalars(_ce_body(logits_ref[...], labels_ref[...]))


def _nce_only_kernel(z1s_ref, z1t_ref, z2s_ref, z2t_ref, out_ref,
                     z1n_ref, z2n_ref, neg_top_ref, neg_bot_ref,
                     *, inv_temp, b_valid, b_pad):
    out_ref[...] = _pack_scalars(
        _infonce_body(z1s_ref, z1t_ref, z2s_ref, z2t_ref,
                      z1n_ref, z2n_ref, neg_top_ref, neg_bot_ref,
                      inv_temp=inv_temp, b_valid=b_valid, b_pad=b_pad))


# ------------------------------ call wrappers -------------------------------- #
_VMEM_SPEC = pl.BlockSpec(memory_space=pltpu.MemorySpace.VMEM)
_OUT_SHAPE = jax.ShapeDtypeStruct((1, _OUT_LANES), jnp.float32)


def _scalar_call(kernel, arrays, scratch_shapes=(), vmem_limit_bytes=None):
    params = None
    if vmem_limit_bytes is not None:
        params = pltpu.CompilerParams(vmem_limit_bytes=int(vmem_limit_bytes))
    return pl.pallas_call(
        kernel,
        out_shape=_OUT_SHAPE,
        in_specs=[_VMEM_SPEC] * len(arrays),
        out_specs=_VMEM_SPEC,
        scratch_shapes=list(scratch_shapes),
        compiler_params=params,
    )(*arrays)


def _pad2d(x, rows, cols):
    r, c = x.shape
    if r == rows and c == cols:
        return x
    return jnp.pad(x, ((0, rows - r), (0, cols - c)))


# ----------------------------- module forward ------------------------------- #
def contrastive_da_loss(z1_src, z2_src, z1_tgt, z2_tgt, logits, labels,
                        temperature=0.5, weight=1.0):
    inv_temp = 1.0 / float(temperature)
    weight = float(weight)
    zero = jnp.float32(0.0)

    has_cls = labels is not None
    has_nce = z2_src is not None

    if has_cls:
        b_cls = logits[0].shape[0]
        labels2d = labels.astype(jnp.int32).reshape(b_cls, 1)

    if has_nce:
        b, d = z1_src.shape
        b_pad = _round_up(b, _SUBLANE)     # sublane-aligned rows per half
        d_pad = _round_up(d, _LANE)        # lane-aligned feature dim
        m = 2 * b_pad
        emb = [_pad2d(x.astype(jnp.float32), b_pad, d_pad)
               for x in (z1_src, z1_tgt, z2_src, z2_tgt)]
        scratch = (
            pltpu.VMEM((m, d_pad), jnp.bfloat16),   # z1n = [z1_src; z1_tgt]
            pltpu.VMEM((m, d_pad), jnp.bfloat16),   # z2n = [z2_src; z2_tgt]
            pltpu.VMEM((m, 1), jnp.float32),        # neg_top row-sum accumulator
            pltpu.VMEM((1, m), jnp.float32),        # neg_bot col-sum row
        )
        tc = min(m, _TC_MAX)
        est = (8 * b_pad * d_pad * 4      # padded inputs + normalize transients
               + 2 * m * d_pad * 2        # bf16 scratch
               + 3 * m * tc * 4           # one strip's exp blocks
               + 2 * tc * d_pad * 4)      # per-strip diag transients
        vmem_limit = min(128 * 1024 * 1024, max(32 * 1024 * 1024, 2 * est))

    if has_cls and has_nce:
        out = _scalar_call(
            functools.partial(_fused_kernel, inv_temp=inv_temp, weight=weight,
                              b_valid=b, b_pad=b_pad),
            (*emb, logits[0], labels2d),
            scratch_shapes=scratch, vmem_limit_bytes=vmem_limit)
        cls_loss, contrast_loss, total = out[0, 0], out[0, 1], out[0, 2]
    elif has_cls:
        cls_loss = _scalar_call(_ce_only_kernel, (logits[0], labels2d))[0, 0]
        contrast_loss = zero
        total = cls_loss
    elif has_nce:
        out = _scalar_call(
            functools.partial(_nce_only_kernel, inv_temp=inv_temp,
                              b_valid=b, b_pad=b_pad),
            tuple(emb), scratch_shapes=scratch, vmem_limit_bytes=vmem_limit)
        contrast_loss = out[0, 0]
        cls_loss = zero
        total = weight * contrast_loss
    else:
        cls_loss = contrast_loss = total = zero

    entropy_loss = jnp.float32(0.0)
    y_entropy = jnp.float32(0.0)
    return total, contrast_loss, cls_loss, entropy_loss, y_entropy


# --------------------------- pure-JAX reference ------------------------------ #
def _reference(z1_src, z2_src, z1_tgt, z2_tgt, logits, labels,
               temperature, weight):
    logits0 = logits[0].astype(jnp.float32)
    lse = jax.nn.logsumexp(logits0, axis=-1)
    true_logit = jnp.take_along_axis(
        logits0, labels[:, None].astype(jnp.int32), axis=-1)[:, 0]
    cls = jnp.mean(lse - true_logit)

    z1 = jnp.concatenate([z1_src, z1_tgt], axis=0).astype(jnp.float32)
    z2 = jnp.concatenate([z2_src, z2_tgt], axis=0).astype(jnp.float32)
    z1 = z1 / jnp.maximum(jnp.linalg.norm(z1, axis=-1, keepdims=True), 1e-12)
    z2 = z2 / jnp.maximum(jnp.linalg.norm(z2, axis=-1, keepdims=True), 1e-12)
    z = jnp.concatenate([z1, z2], axis=0)
    n = z.shape[0]
    sim = jnp.exp(z @ z.T / temperature)
    neg = jnp.sum(sim * (1.0 - jnp.eye(n, dtype=jnp.float32)), axis=-1)
    pos = jnp.exp(jnp.sum(z1 * z2, axis=-1) / temperature)
    pos = jnp.concatenate([pos, pos], axis=0)
    contrast = -jnp.mean(jnp.log(pos / neg))
    return cls + weight * contrast, contrast, cls


if __name__ == "__main__":
    key = jax.random.PRNGKey(0)
    k1, k2, k3, k4, k5, k6 = jax.random.split(key, 6)

    B = 2        # samples per domain (src / tgt)
    D = 32       # embedding dim
    C = 4        # number of classes
    temperature = 0.5   # stands in for args.temperature_scheduler.temperature

    z1_src = jax.random.normal(k1, (B, D), dtype=jnp.float32)
    z2_src = jax.random.normal(k2, (B, D), dtype=jnp.float32)
    z1_tgt = jax.random.normal(k3, (B, D), dtype=jnp.float32)
    z2_tgt = jax.random.normal(k4, (B, D), dtype=jnp.float32)
    logits0 = jax.random.normal(k5, (B, C), dtype=jnp.float32)
    labels = jax.random.randint(k6, (B,), 0, C, dtype=jnp.int32)

    total, contrast_loss, cls_loss, entropy_loss, y_entropy = contrastive_da_loss(
        z1_src, z2_src, z1_tgt, z2_tgt, (logits0,), labels,
        temperature=temperature, weight=1.0)
    jax.block_until_ready(total)
    jax.block_until_ready(contrast_loss)
    jax.block_until_ready(cls_loss)

    # Quiet tolerance check against the pure-JAX reference (bf16 MXU feed).
    ref_total, ref_contrast, ref_cls = _reference(
        z1_src, z2_src, z1_tgt, z2_tgt, (logits0,), labels, temperature, 1.0)
    for got, ref in ((total, ref_total), (contrast_loss, ref_contrast),
                     (cls_loss, ref_cls)):
        g, r = float(got), float(ref)
        if not abs(g - r) <= 5e-2 + 2e-2 * abs(r):
            raise SystemExit(f"mismatch: kernel={g} reference={r}")

    print("KERNEL_OK")
</pallas_src>

<mosaic_0001>
module attributes {stable_mosaic.version = 11 : i64} {
  func.func @_fused_kernel(%arg0: memref<8x128xf32, #tpu.memory_space<vmem>>, %arg1: memref<8x128xf32, #tpu.memory_space<vmem>>, %arg2: memref<8x128xf32, #tpu.memory_space<vmem>>, %arg3: memref<8x128xf32, #tpu.memory_space<vmem>>, %arg4: memref<2x4xf32, #tpu.memory_space<vmem>>, %arg5: memref<2x1xi32, #tpu.memory_space<vmem>>, %arg6: memref<1x128xf32, #tpu.memory_space<vmem>>, %arg7: memref<16x128xbf16, #tpu.memory_space<vmem>>, %arg8: memref<16x128xbf16, #tpu.memory_space<vmem>>, %arg9: memref<16x1xf32, #tpu.memory_space<vmem>>, %arg10: memref<1x16xf32, #tpu.memory_space<vmem>>) attributes {dimension_semantics = [], scalar_prefetch = 0 : i64, scratch_operands = 4 : i64, tpu.core_type = #tpu.core_type<tc>} {
    %c0 = arith.constant 0 : index
    %c0_0 = arith.constant 0 : index
    %0 = vector.load %arg4[%c0, %c0_0] : memref<2x4xf32, #tpu.memory_space<vmem>>, vector<2x4xf32>
    %c0_1 = arith.constant 0 : index
    %c0_2 = arith.constant 0 : index
    %1 = vector.load %arg5[%c0_1, %c0_2] : memref<2x1xi32, #tpu.memory_space<vmem>>, vector<2x1xi32>
    %cst = arith.constant dense<0xFF800000> : vector<2xf32>
    %2 = vector.multi_reduction <maximumf>, %0, %cst [1] : vector<2x4xf32> to vector<2xf32>
    %3 = vector.shape_cast %2 : vector<2xf32> to vector<2x1xf32>
    %4 = vector.broadcast %3 : vector<2x1xf32> to vector<2x4xf32>
    %5 = arith.subf %0, %4 : vector<2x4xf32>
    %6 = math.exp %5 : vector<2x4xf32>
    %cst_3 = arith.constant dense<0.000000e+00> : vector<2xf32>
    %7 = vector.multi_reduction <add>, %6, %cst_3 [1] : vector<2x4xf32> to vector<2xf32>
    %8 = vector.shape_cast %7 : vector<2xf32> to vector<2x1xf32>
    %9 = math.log %8 : vector<2x1xf32>
    %10 = arith.addf %9, %3 : vector<2x1xf32>
    %11 = tpu.iota {dimensions = array<i32: 1>} : vector<2x4xi32>
    %12 = vector.broadcast %1 : vector<2x1xi32> to vector<2x4xi32>
    %13 = arith.cmpi eq, %11, %12 : vector<2x4xi32>
    %cst_4 = arith.constant 0.000000e+00 : f32
    %14 = vector.broadcast %cst_4 : f32 to vector<2x4xf32>
    %15 = arith.select %13, %0, %14 : vector<2x4xi1>, vector<2x4xf32>
    %cst_5 = arith.constant dense<0.000000e+00> : vector<2xf32>
    %16 = vector.multi_reduction <add>, %15, %cst_5 [1] : vector<2x4xf32> to vector<2xf32>
    %17 = vector.shape_cast %16 : vector<2xf32> to vector<2x1xf32>
    %18 = arith.subf %10, %17 : vector<2x1xf32>
    %19 = vector.shape_cast %18 : vector<2x1xf32> to vector<1x2x1xf32>
    %cst_6 = arith.constant dense<0.000000e+00> : vector<1xf32>
    %20 = vector.multi_reduction <add>, %19, %cst_6 [1, 2] : vector<1x2x1xf32> to vector<1xf32>
    %21 = vector.shape_cast %20 : vector<1xf32> to vector<1x1x1xf32>
    %22 = vector.extract %21[0, 0, 0] : f32 from vector<1x1x1xf32>
    %cst_7 = arith.constant 2.000000e+00 : f32
    %23 = arith.divf %22, %cst_7 : f32
    %cst_8 = arith.constant 1.000000e+00 : f32
    %24 = vector.broadcast %cst_8 : f32 to vector<1x128xf32>
    %c0_9 = arith.constant 0 : index
    %c0_10 = arith.constant 0 : index
    %25 = vector.load %arg0[%c0_9, %c0_10] : memref<8x128xf32, #tpu.memory_space<vmem>>, vector<8x128xf32>
    %26 = arith.mulf %25, %25 : vector<8x128xf32>
    %cst_11 = arith.constant dense<0.000000e+00> : vector<8xf32>
    %27 = vector.multi_reduction <add>, %26, %cst_11 [1] : vector<8x128xf32> to vector<8xf32>
    %28 = vector.shape_cast %27 : vector<8xf32> to vector<8x1xf32>
    %cst_12 = arith.constant 1.000000e-24 : f32
    %29 = vector.broadcast %cst_12 : f32 to vector<8x1xf32>
    %30 = arith.maximumf %28, %29 : vector<8x1xf32>
    %31 = math.rsqrt %30 : vector<8x1xf32>
    %32 = vector.broadcast %31 : vector<8x1xf32> to vector<8x128xf32>
    %33 = arith.mulf %25, %32 : vector<8x128xf32>
    %c0_13 = arith.constant 0 : index
    %c0_14 = arith.constant 0 : index
    %34 = vector.load %arg2[%c0_13, %c0_14] : memref<8x128xf32, #tpu.memory_space<vmem>>, vector<8x128xf32>
    %35 = arith.mulf %34, %34 : vector<8x128xf32>
    %cst_15 = arith.constant dense<0.000000e+00> : vector<8xf32>
    %36 = vector.multi_reduction <add>, %35, %cst_15 [1] : vector<8x128xf32> to vector<8xf32>
    %37 = vector.shape_cast %36 : vector<8xf32> to vector<8x1xf32>
    %cst_16 = arith.constant 1.000000e-24 : f32
    %38 = vector.broadcast %cst_16 : f32 to vector<8x1xf32>
    %39 = arith.maximumf %37, %38 : vector<8x1xf32>
    %40 = math.rsqrt %39 : vector<8x1xf32>
    %41 = vector.broadcast %40 : vector<8x1xf32> to vector<8x128xf32>
    %42 = arith.mulf %34, %41 : vector<8x128xf32>
    %43 = arith.mulf %33, %42 : vector<8x128xf32>
    %44 = vector.shape_cast %43 : vector<8x128xf32> to vector<1x8x128xf32>
    %cst_17 = arith.constant dense<0.000000e+00> : vector<1xf32>
    %45 = vector.multi_reduction <add>, %44, %cst_17 [1, 2] : vector<1x8x128xf32> to vector<1xf32>
    %46 = vector.shape_cast %45 : vector<1xf32> to vector<1x1x1xf32>
    %47 = vector.extract %46[0, 0, 0] : f32 from vector<1x1x1xf32>
    %cst_18 = arith.constant 0.000000e+00 : f32
    %48 = arith.addf %cst_18, %47 : f32
    %49 = arith.truncf %33 : vector<8x128xf32> to vector<8x128xbf16>
    %c0_19 = arith.constant 0 : index
    %c0_20 = arith.constant 0 : index
    %50 = vector.load %arg7[%c0_19, %c0_20] : memref<16x128xbf16, #tpu.memory_space<vmem>>, vector<8x128xbf16>
    tpu.vector_store %arg7[%c0_19, %c0_20], %49 {strides = array<i32>} : memref<16x128xbf16, #tpu.memory_space<vmem>>, vector<8x128xbf16>,
    %51 = arith.truncf %42 : vector<8x128xf32> to vector<8x128xbf16>
    %c0_21 = arith.constant 0 : index
    %c0_22 = arith.constant 0 : index
    %52 = vector.load %arg8[%c0_21, %c0_22] : memref<16x128xbf16, #tpu.memory_space<vmem>>, vector<8x128xbf16>
    tpu.vector_store %arg8[%c0_21, %c0_22], %51 {strides = array<i32>} : memref<16x128xbf16, #tpu.memory_space<vmem>>, vector<8x128xbf16>,
    %c0_23 = arith.constant 0 : index
    %c0_24 = arith.constant 0 : index
    %53 = vector.load %arg1[%c0_23, %c0_24] : memref<8x128xf32, #tpu.memory_space<vmem>>, vector<8x128xf32>
    %54 = arith.mulf %53, %53 : vector<8x128xf32>
    %cst_25 = arith.constant dense<0.000000e+00> : vector<8xf32>
    %55 = vector.multi_reduction <add>, %54, %cst_25 [1] : vector<8x128xf32> to vector<8xf32>
    %56 = vector.shape_cast %55 : vector<8xf32> to vector<8x1xf32>
    %cst_26 = arith.constant 1.000000e-24 : f32
    %57 = vector.broadcast %cst_26 : f32 to vector<8x1xf32>
    %58 = arith.maximumf %56, %57 : vector<8x1xf32>
    %59 = math.rsqrt %58 : vector<8x1xf32>
    %60 = vector.broadcast %59 : vector<8x1xf32> to vector<8x128xf32>
    %61 = arith.mulf %53, %60 : vector<8x128xf32>
    %c0_27 = arith.constant 0 : index
    %c0_28 = arith.constant 0 : index
    %62 = vector.load %arg3[%c0_27, %c0_28] : memref<8x128xf32, #tpu.memory_space<vmem>>, vector<8x128xf32>
    %63 = arith.mulf %62, %62 : vector<8x128xf32>
    %cst_29 = arith.constant dense<0.000000e+00> : vector<8xf32>
    %64 = vector.multi_reduction <add>, %63, %cst_29 [1] : vector<8x128xf32> to vector<8xf32>
    %65 = vector.shape_cast %64 : vector<8xf32> to vector<8x1xf32>
    %cst_30 = arith.constant 1.000000e-24 : f32
    %66 = vector.broadcast %cst_30 : f32 to vector<8x1xf32>
    %67 = arith.maximumf %65, %66 : vector<8x1xf32>
    %68 = math.rsqrt %67 : vector<8x1xf32>
    %69 = vector.broadcast %68 : vector<8x1xf32> to vector<8x128xf32>
    %70 = arith.mulf %62, %69 : vector<8x128xf32>
    %71 = arith.mulf %61, %70 : vector<8x128xf32>
    %72 = vector.shape_cast %71 : vector<8x128xf32> to vector<1x8x128xf32>
    %cst_31 = arith.constant dense<0.000000e+00> : vector<1xf32>
    %73 = vector.multi_reduction <add>, %72, %cst_31 [1, 2] : vector<1x8x128xf32> to vector<1xf32>
    %74 = vector.shape_cast %73 : vector<1xf32> to vector<1x1x1xf32>
    %75 = vector.extract %74[0, 0, 0] : f32 from vector<1x1x1xf32>
    %76 = arith.addf %48, %75 : f32
    %77 = arith.truncf %61 : vector<8x128xf32> to vector<8x128xbf16>
    %c8 = arith.constant 8 : index
    %c0_32 = arith.constant 0 : index
    %78 = vector.load %arg7[%c8, %c0_32] : memref<16x128xbf16, #tpu.memory_space<vmem>>, vector<8x128xbf16>
    tpu.vector_store %arg7[%c8, %c0_32], %77 {strides = array<i32>} : memref<16x128xbf16, #tpu.memory_space<vmem>>, vector<8x128xbf16>,
    %79 = arith.truncf %70 : vector<8x128xf32> to vector<8x128xbf16>
    %c8_33 = arith.constant 8 : index
    %c0_34 = arith.constant 0 : index
    %80 = vector.load %arg8[%c8_33, %c0_34] : memref<16x128xbf16, #tpu.memory_space<vmem>>, vector<8x128xbf16>
    tpu.vector_store %arg8[%c8_33, %c0_34], %79 {strides = array<i32>} : memref<16x128xbf16, #tpu.memory_space<vmem>>, vector<8x128xbf16>,
    %cst_35 = arith.constant 0.000000e+00 : f32
    %81 = vector.broadcast %cst_35 : f32 to vector<16x1xf32>
    %c0_36 = arith.constant 0 : index
    %c0_37 = arith.constant 0 : index
    %82 = vector.load %arg9[%c0_36, %c0_37] : memref<16x1xf32, #tpu.memory_space<vmem>>, vector<16x1xf32>
    tpu.vector_store %arg9[%c0_36, %c0_37], %81 {strides = array<i32>} : memref<16x1xf32, #tpu.memory_space<vmem>>, vector<16x1xf32>,
    %c0_38 = arith.constant 0 : index
    %c0_39 = arith.constant 0 : index
    %83 = vector.load %arg7[%c0_38, %c0_39] : memref<16x128xbf16, #tpu.memory_space<vmem>>, vector<16x128xbf16>
    %c0_40 = arith.constant 0 : index
    %c0_41 = arith.constant 0 : index
    %84 = vector.load %arg8[%c0_40, %c0_41] : memref<16x128xbf16, #tpu.memory_space<vmem>>, vector<16x128xbf16>
    %c0_42 = arith.constant 0 : index
    %c0_43 = arith.constant 0 : index
    %85 = vector.load %arg7[%c0_42, %c0_43] : memref<16x128xbf16, #tpu.memory_space<vmem>>, vector<16x128xbf16>
    %c0_44 = arith.constant 0 : index
    %c0_45 = arith.constant 0 : index
    %86 = vector.load %arg8[%c0_44, %c0_45] : memref<16x128xbf16, #tpu.memory_space<vmem>>, vector<16x128xbf16>
    %cst_46 = arith.constant dense<0.000000e+00> : vector<16x16xf32>
    %87 = tpu.matmul %83, %85, %cst_46 {dimension_numbers = #tpu.dot_dimension_numbers<[1], [1], [0], [0], [0, 0, 1, 0], [], []>} : vector<16x128xbf16>, vector<16x128xbf16>, vector<16x16xf32> -> vector<16x16xf32>
    %cst_47 = arith.constant 2.000000e+00 : f32
    %88 = vector.broadcast %cst_47 : f32 to vector<16x16xf32>
    %89 = arith.mulf %87, %88 : vector<16x16xf32>
    %90 = math.exp %89 : vector<16x16xf32>
    %cst_48 = arith.constant dense<0.000000e+00> : vector<16x16xf32>
    %91 = tpu.matmul %83, %86, %cst_48 {dimension_numbers = #tpu.dot_dimension_numbers<[1], [1], [0], [0], [0, 0, 1, 0], [], []>} : vector<16x128xbf16>, vector<16x128xbf16>, vector<16x16xf32> -> vector<16x16xf32>
    %cst_49 = arith.constant 2.000000e+00 : f32
    %92 = vector.broadcast %cst_49 : f32 to vector<16x16xf32>
    %93 = arith.mulf %91, %92 : vector<16x16xf32>
    %94 = math.exp %93 : vector<16x16xf32>
    %cst_50 = arith.constant dense<0.000000e+00> : vector<16x16xf32>
    %95 = tpu.matmul %84, %86, %cst_50 {dimension_numbers = #tpu.dot_dimension_numbers<[1], [1], [0], [0], [0, 0, 1, 0], [], []>} : vector<16x128xbf16>, vector<16x128xbf16>, vector<16x16xf32> -> vector<16x16xf32>
    %cst_51 = arith.constant 2.000000e+00 : f32
    %96 = vector.broadcast %cst_51 : f32 to vector<16x16xf32>
    %97 = arith.mulf %95, %96 : vector<16x16xf32>
    %98 = math.exp %97 : vector<16x16xf32>
    %99 = arith.extf %85 : vector<16x128xbf16> to vector<16x128xf32>
    %100 = arith.extf %86 : vector<16x128xbf16> to vector<16x128xf32>
    %101 = arith.mulf %99, %99 : vector<16x128xf32>
    %cst_52 = arith.constant dense<0.000000e+00> : vector<16xf32>
    %102 = vector.multi_reduction <add>, %101, %cst_52 [1] : vector<16x128xf32> to vector<16xf32>
    %103 = vector.shape_cast %102 : vector<16xf32> to vector<16x1xf32>
    %104 = arith.mulf %100, %100 : vector<16x128xf32>
    %cst_53 = arith.constant dense<0.000000e+00> : vector<1x16xf32>
    %105 = tpu.matmul %24, %104, %cst_53 {dimension_numbers = #tpu.dot_dimension_numbers<[1], [1], [0], [0], [0, 0, 1, 0], [], []>} : vector<1x128xf32>, vector<16x128xf32>, vector<1x16xf32> -> vector<1x16xf32>
    %c0_54 = arith.constant 0 : index
    %c0_55 = arith.constant 0 : index
    %106 = vector.load %arg9[%c0_54, %c0_55] : memref<16x1xf32, #tpu.memory_space<vmem>>, vector<16x1xf32>
    %cst_56 = arith.constant dense<0.000000e+00> : vector<16xf32>
    %107 = vector.multi_reduction <add>, %90, %cst_56 [1] : vector<16x16xf32> to vector<16xf32>
    %108 = vector.shape_cast %107 : vector<16xf32> to vector<16x1xf32>
    %cst_57 = arith.constant dense<0.000000e+00> : vector<16xf32>
    %109 = vector.multi_reduction <add>, %94, %cst_57 [1] : vector<16x16xf32> to vector<16xf32>
    %110 = vector.shape_cast %109 : vector<16xf32> to vector<16x1xf32>
    %111 = arith.addf %108, %110 : vector<16x1xf32>
    %112 = arith.addf %106, %111 : vector<16x1xf32>
    %c0_58 = arith.constant 0 : index
    %c0_59 = arith.constant 0 : index
    %113 = vector.load %arg9[%c0_58, %c0_59] : memref<16x1xf32, #tpu.memory_space<vmem>>, vector<16x1xf32>
    tpu.vector_store %arg9[%c0_58, %c0_59], %112 {strides = array<i32>} : memref<16x1xf32, #tpu.memory_space<vmem>>, vector<16x1xf32>,
    %c0_60 = arith.constant 0 : index
    %c0_61 = arith.constant 0 : index
    %114 = vector.load %arg9[%c0_60, %c0_61] : memref<16x1xf32, #tpu.memory_space<vmem>>, vector<16x1xf32>
    %cst_62 = arith.constant 2.000000e+00 : f32
    %115 = vector.broadcast %cst_62 : f32 to vector<16x1xf32>
    %116 = arith.mulf %103, %115 : vector<16x1xf32>
    %117 = math.exp %116 : vector<16x1xf32>
    %118 = arith.subf %114, %117 : vector<16x1xf32>
    %c0_63 = arith.constant 0 : index
    %c0_64 = arith.constant 0 : index
    %119 = vector.load %arg9[%c0_63, %c0_64] : memref<16x1xf32, #tpu.memory_space<vmem>>, vector<16x1xf32>
    tpu.vector_store %arg9[%c0_63, %c0_64], %118 {strides = array<i32>} : memref<16x1xf32, #tpu.memory_space<vmem>>, vector<16x1xf32>,
    %cst_65 = arith.constant dense<0.000000e+00> : vector<16xf32>
    %120 = vector.multi_reduction <add>, %94, %cst_65 [0] : vector<16x16xf32> to vector<16xf32>
    %121 = vector.shape_cast %120 : vector<16xf32> to vector<1x16xf32>
    %cst_66 = arith.constant dense<0.000000e+00> : vector<16xf32>
    %122 = vector.multi_reduction <add>, %98, %cst_66 [0] : vector<16x16xf32> to vector<16xf32>
    %123 = vector.shape_cast %122 : vector<16xf32> to vector<1x16xf32>
    %124 = arith.addf %121, %123 : vector<1x16xf32>
    %cst_67 = arith.constant 2.000000e+00 : f32
    %125 = vector.broadcast %cst_67 : f32 to vector<1x16xf32>
    %126 = arith.mulf %105, %125 : vector<1x16xf32>
    %127 = math.exp %126 : vector<1x16xf32>
    %128 = arith.subf %124, %127 : vector<1x16xf32>
    %c0_68 = arith.constant 0 : index
    %c0_69 = arith.constant 0 : index
    %129 = vector.load %arg10[%c0_68, %c0_69] : memref<1x16xf32, #tpu.memory_space<vmem>>, vector<1x16xf32>
    tpu.vector_store %arg10[%c0_68, %c0_69], %128 {strides = array<i32>} : memref<1x16xf32, #tpu.memory_space<vmem>>, vector<1x16xf32>,
    %c0_70 = arith.constant 0 : index
    %c0_71 = arith.constant 0 : index
    %130 = vector.load %arg9[%c0_70, %c0_71] : memref<16x1xf32, #tpu.memory_space<vmem>>, vector<16x1xf32>
    %cst_72 = arith.constant 2.400000e+01 : f32
    %131 = vector.broadcast %cst_72 : f32 to vector<16x1xf32>
    %132 = arith.subf %130, %131 : vector<16x1xf32>
    %c0_73 = arith.constant 0 : index
    %c0_74 = arith.constant 0 : index
    %133 = vector.load %arg10[%c0_73, %c0_74] : memref<1x16xf32, #tpu.memory_space<vmem>>, vector<1x16xf32>
    %cst_75 = arith.constant 2.400000e+01 : f32
    %134 = vector.broadcast %cst_75 : f32 to vector<1x16xf32>
    %135 = arith.subf %133, %134 : vector<1x16xf32>
    %136 = tpu.iota {dimensions = array<i32: 0>} : vector<16x1xi32>
    %137 = tpu.iota {dimensions = array<i32: 1>} : vector<1x16xi32>
    %c8_i32 = arith.constant 8 : i32
    %138 = vector.broadcast %c8_i32 : i32 to vector<16x1xi32>
    %139 = arith.cmpi sge, %136, %138 : vector<16x1xi32>
    %c8_i32_76 = arith.constant 8 : i32
    %140 = vector.broadcast %c8_i32_76 : i32 to vector<16x1xi32>
    %141 = arith.subi %136, %140 : vector<16x1xi32>
    %142 = arith.select %139, %141, %136 : vector<16x1xi1>, vector<16x1xi32>
    %c2_i32 = arith.constant 2 : i32
    %143 = vector.broadcast %c2_i32 : i32 to vector<16x1xi32>
    %144 = arith.cmpi slt, %142, %143 : vector<16x1xi32>
    %c8_i32_77 = arith.constant 8 : i32
    %145 = vector.broadcast %c8_i32_77 : i32 to vector<1x16xi32>
    %146 = arith.cmpi sge, %137, %145 : vector<1x16xi32>
    %c8_i32_78 = arith.constant 8 : i32
    %147 = vector.broadcast %c8_i32_78 : i32 to vector<1x16xi32>
    %148 = arith.subi %137, %147 : vector<1x16xi32>
    %149 = arith.select %146, %148, %137 : vector<1x16xi1>, vector<1x16xi32>
    %c2_i32_79 = arith.constant 2 : i32
    %150 = vector.broadcast %c2_i32_79 : i32 to vector<1x16xi32>
    %151 = arith.cmpi slt, %149, %150 : vector<1x16xi32>
    %cst_80 = arith.constant 1.000000e-30 : f32
    %152 = vector.broadcast %cst_80 : f32 to vector<16x1xf32>
    %153 = arith.maximumf %132, %152 : vector<16x1xf32>
    %154 = math.log %153 : vector<16x1xf32>
    %cst_81 = arith.constant 0.000000e+00 : f32
    %155 = vector.broadcast %cst_81 : f32 to vector<16x1xf32>
    %156 = arith.select %144, %154, %155 : vector<16x1xi1>, vector<16x1xf32>
    %cst_82 = arith.constant 1.000000e-30 : f32
    %157 = vector.broadcast %cst_82 : f32 to vector<1x16xf32>
    %158 = arith.maximumf %135, %157 : vector<1x16xf32>
    %159 = math.log %158 : vector<1x16xf32>
    %cst_83 = arith.constant 0.000000e+00 : f32
    %160 = vector.broadcast %cst_83 : f32 to vector<1x16xf32>
    %161 = arith.select %151, %159, %160 : vector<1x16xi1>, vector<1x16xf32>
    %162 = vector.shape_cast %156 : vector<16x1xf32> to vector<1x16x1xf32>
    %cst_84 = arith.constant dense<0.000000e+00> : vector<1xf32>
    %163 = vector.multi_reduction <add>, %162, %cst_84 [1, 2] : vector<1x16x1xf32> to vector<1xf32>
    %164 = vector.shape_cast %163 : vector<1xf32> to vector<1x1x1xf32>
    %165 = vector.extract %164[0, 0, 0] : f32 from vector<1x1x1xf32>
    %166 = vector.shape_cast %161 : vector<1x16xf32> to vector<1x1x16xf32>
    %cst_85 = arith.constant dense<0.000000e+00> : vector<1xf32>
    %167 = vector.multi_reduction <add>, %166, %cst_85 [1, 2] : vector<1x1x16xf32> to vector<1xf32>
    %168 = vector.shape_cast %167 : vector<1xf32> to vector<1x1x1xf32>
    %169 = vector.extract %168[0, 0, 0] : f32 from vector<1x1x1xf32>
    %170 = arith.addf %165, %169 : f32
    %cst_86 = arith.constant 2.000000e+00 : f32
    %171 = arith.mulf %cst_86, %76 : f32
    %cst_87 = arith.constant 2.000000e+00 : f32
    %172 = arith.mulf %171, %cst_87 : f32
    %173 = arith.subf %170, %172 : f32
    %cst_88 = arith.constant 8.000000e+00 : f32
    %174 = arith.divf %173, %cst_88 : f32
    %cst_89 = arith.constant 1.000000e+00 : f32
    %175 = arith.mulf %cst_89, %174 : f32
    %176 = arith.addf %23, %175 : f32
    %177 = tpu.iota {dimensions = array<i32: 1>} : vector<1x128xi32>
    %cst_90 = arith.constant 0.000000e+00 : f32
    %178 = vector.broadcast %cst_90 : f32 to vector<1x128xf32>
    %c0_i32 = arith.constant 0 : i32
    %179 = vector.broadcast %c0_i32 : i32 to vector<1x128xi32>
    %180 = arith.cmpi eq, %177, %179 : vector<1x128xi32>
    %cst_91 = arith.constant 0.000000e+00 : f32
    %181 = vector.broadcast %23 : f32 to vector<1x128xf32>
    %182 = vector.broadcast %cst_91 : f32 to vector<1x128xf32>
    %183 = arith.select %180, %181, %182 : vector<1x128xi1>, vector<1x128xf32>
    %184 = arith.addf %178, %183 : vector<1x128xf32>
    %c1_i32 = arith.constant 1 : i32
    %185 = vector.broadcast %c1_i32 : i32 to vector<1x128xi32>
    %186 = arith.cmpi eq, %177, %185 : vector<1x128xi32>
    %cst_92 = arith.constant 0.000000e+00 : f32
    %187 = vector.broadcast %174 : f32 to vector<1x128xf32>
    %188 = vector.broadcast %cst_92 : f32 to vector<1x128xf32>
    %189 = arith.select %186, %187, %188 : vector<1x128xi1>, vector<1x128xf32>
    %190 = arith.addf %184, %189 : vector<1x128xf32>
    %c2_i32_93 = arith.constant 2 : i32
    %191 = vector.broadcast %c2_i32_93 : i32 to vector<1x128xi32>
    %192 = arith.cmpi eq, %177, %191 : vector<1x128xi32>
    %cst_94 = arith.constant 0.000000e+00 : f32
    %193 = vector.broadcast %176 : f32 to vector<1x128xf32>
    %194 = vector.broadcast %cst_94 : f32 to vector<1x128xf32>
    %195 = arith.select %192, %193, %194 : vector<1x128xi1>, vector<1x128xf32>
    %196 = arith.addf %190, %195 : vector<1x128xf32>
    %c0_95 = arith.constant 0 : index
    %c0_96 = arith.constant 0 : index
    %197 = vector.load %arg6[%c0_95, %c0_96] : memref<1x128xf32, #tpu.memory_space<vmem>>, vector<1x128xf32>
    tpu.vector_store %arg6[%c0_95, %c0_96], %196 {strides = array<i32>} : memref<1x128xf32, #tpu.memory_space<vmem>>, vector<1x128xf32>,
    return
  }
}

</mosaic_0001>

<bundles_post_ra>
// kernel: tpu_custom_call.1
= control target key start
LH: loop header
LB: loop body
LE: loop exit
PB: predicated region body
PF: predicated region fallthrough
CT: control target
= control target key end

     0   :  { %11 = vsyncpa [#allocation7], 0  ;;  %s817_s0 = inlined_call_operand.hbm [shape: f32[8,128], index: 0, kind: input, shape index: {}]   ;;  %s818_s1 = inlined_call_operand.hbm [shape: f32[8,128], index: 1, kind: input, shape index: {}]   ;;  %s819_s2 = inlined_call_operand.hbm [shape: f32[8,128], index: 2, kind: input, shape index: {}]   ;;  %s820_s3 = inlined_call_operand.hbm [shape: f32[8,128], index: 3, kind: input, shape index: {}]   ;;  %s821_s4 = inlined_call_operand.vmem [shape: f32[2,4], index: 4, kind: input, shape index: {}]   ;;  %s822_s5 = inlined_call_operand.vmem [shape: s32[2,1], index: 5, kind: input, shape index: {}]   ;;  %s823_s6 = inlined_call_operand.hbm [shape: f32[1,128], index: 6, kind: output, shape index: {}]  }
   0x1   :  { %12 = vsyncpa [#allocation10], 0 }
   0x2   :  { %13 = vsyncpa [#allocation13], 0  ;;  %s31_s23 = sshll.u32 %s818_s1, 4  ;;  %s32_s23 = int_to_ptr.hbm [resolvable:$true] %s31_s23 }
   0x3   :  { %14 = vsyncpa [#allocation8], 0  ;;  %s696_s24 = smov [#allocation9]   ;;  %s20_s28 = sshll.u32 %s817_s0, 4  ;;  %s21_s28 = int_to_ptr.hbm [resolvable:$true] %s20_s28 }
   0x4   :  { %s33_s25 = sshll.u32 %s696_s24, 4  ;;  %s697_s29 = smov [#allocation6]   ;;  %s34_s25 = int_to_ptr.vmem [resolvable:$true] %s33_s25 }
   0x5   :  { %36 = dma.hbm_to_vmem [thread:$0]  %s32_s23, 128, %s34_s25, [#allocation10]  }
   0x6   :  { %s22_s30 = sshll.u32 %s697_s29, 4  ;;  %s42_s9 = sshll.u32 %s819_s2, 4  ;;  %s23_s30 = int_to_ptr.vmem [resolvable:$true] %s22_s30  ;;  %s43_s9 = int_to_ptr.hbm [resolvable:$true] %s42_s9 }
   0x7   :  { %25 = dma.hbm_to_vmem [thread:$0]  %s21_s28, 128, %s23_s30, [#allocation7]  }
   0x8   :  { %s53_s11 = sshll.u32 %s820_s3, 4  ;;  %s698_s12 = smov [#allocation11]   ;;  %s54_s11 = int_to_ptr.hbm [resolvable:$true] %s53_s11 }
   0x9   :  { %s44_s13 = sshll.u32 %s698_s12, 4  ;;  %s699_s0 = smov [#allocation12]   ;;  %s45_s13 = int_to_ptr.vmem [resolvable:$true] %s44_s13 }
   0xa   :  { %47 = dma.hbm_to_vmem [thread:$0]  %s43_s9, 128, %s45_s13, [#allocation10]  }
   0xb   :  { %s55_s14 = sshll.u32 %s699_s0, 4  ;;  %s56_s14 = int_to_ptr.vmem [resolvable:$true] %s55_s14 }
   0xc   :  { %58 = dma.hbm_to_vmem [thread:$0]  %s54_s11, 128, %s56_s14, [#allocation13]  }
   0xd   :  { %688 = dma.done.wait [#allocation7], 128  }
   0xe   :  { %689 = vsyncadd [#allocation7], 4294967168 }
   0xf   :  { %690 = dma.done.wait [#allocation10], 256  }
  0x10   :  { %691 = vsyncadd [#allocation10], 4294967040 }
  0x11   :  { %692 = dma.done.wait [#allocation13], 128  }
  0x12   :  { %693 = vsyncadd [#allocation13], 4294967168  ;;  %vm82_vm0 = vcmask 25600   ;;  %v173_v0 = vld [vmem:[#allocation9] sm:$0xff]  ;;  %v126_v1 = vld [vmem:[#allocation6] sm:$0xff]  ;;  %v700_v14 = vmov 0  }
  0x13   :  { %v174_v2 = vmul.f32 %v173_v0, %v173_v0  ;;  %v127_v3 = vmul.f32 %v126_v1, %v126_v1  ;;  %v756_v4 = vld [vmem:[%s821_s4] sm:$0x3]  ;;  %v762_v7 = vld [vmem:[#allocation11] sm:$0xff]  ;;  %526 = vset.pattern.permute.xlu2 %v700_v14  ;;  %527 = vset.pattern.permute.xlu0 %v700_v14  ;;  %vm333_vm13 = vcmask 130048   ;;  %vm385_vm15 = vcmask 122880   ;;  %s705_s30 = smov [#allocation14]  }
  0x14   :  { %v83_v5 = vsel %vm82_vm0, %v756_v4, -inf  ;;  %v760_v6 = vld [vmem:[#allocation12] sm:$0xff]  ;;  %v143_v9 = vmul.f32 %v762_v7, %v762_v7  ;;  %s473_s7 = sshll.u32 %s705_s30, 4  ;;  %s475_s1 = sshll.u32 %s823_s6, 4  ;;  %s474_s7 = int_to_ptr.vmem [resolvable:$true] %s473_s7  ;;  %s476_s1 = int_to_ptr.hbm [resolvable:$true] %s475_s1 }
  0x15   :  { %175 = vadd.xlane.f32.xlu1 %v174_v2  ;;  %128 = vadd.xlane.f32.xlu0 %v127_v3  ;;  %v190_v8 = vmul.f32 %v760_v6, %v760_v6  ;;  %v81_v15 = vld [vmem:[%s822_s5] sm:$0x3] }
  0x16   :  { %84 = vmax.xlane.f32.xlu2 %v83_v5 }
  0x1d   :  { %191 = vadd.xlane.f32.xlu1 %v190_v8  ;;  %144 = vadd.xlane.f32.xlu0 %v143_v9 }
  0x2e   :  { %98 = vperm.xlu2 %526, %v81_v15  }
  0x88   :  { %v176_v10 = vpop.xlane.xlu1 %175  ;;  %v129_v11 = vpop.xlane.xlu0 %128 }
  0x89   :  { %v177_v12 = vmax.f32 %v176_v10, 1e-24  ;;  %v130_v13 = vmax.f32 %v129_v11, 1e-24  ;;  %v771_v41 = vpop.xlane.xlu2 %84 }
  0x8a   :  { %v86_v48 = vsub.f32 %v756_v4, %v771_v41 }
  0x8b   :  { %528 = vrsqrt.f32 %v177_v12  ;;  %vm184_vm3 = vweird.f32 %v177_v12  ;;  %vm137_vm5 = vweird.f32 %v130_v13 }
  0x8c   :  { %530 = vrsqrt.f32 %v130_v13  ;;  %v87_v53 = vmul.f32 1.442695, %v86_v48 }
  0x90   :  { %v192_v16 = vpop.xlane.xlu1 %191  ;;  %v145_v17 = vpop.xlane.xlu0 %144 }
  0x91   :  { %v529_v18 = vpop.eup %528  ;;  %v193_v19 = vmax.f32 %v192_v16, 1e-24  ;;  %v146_v20 = vmax.f32 %v145_v17, 1e-24 }
  0x92   :  { %v531_v21 = vpop.eup %530  ;;  %v179_v22 = vmul.f32 %v529_v18, %v177_v12  ;;  %vm185_vm1 = vweird.f32 %v529_v18 }
  0x93   :  { %v132_v23 = vmul.f32 %v531_v21, %v130_v13  ;;  %532 = vrsqrt.f32 %v193_v19  ;;  %vm138_vm2 = vweird.f32 %v531_v21  ;;  %vm186_vm4 = vmor %vm184_vm3, %vm185_vm1  ;;  %vm200_vm9 = vweird.f32 %v193_v19 }
  0x94   :  { %v180_v24 = vmul.f32 %v529_v18, %v179_v22  ;;  %534 = vrsqrt.f32 %v146_v20  ;;  %vm139_vm6 = vmor %vm137_vm5, %vm138_vm2  ;;  %vm153_vm11 = vweird.f32 %v146_v20  ;;  %vm106_vm1 = vcmask 1024  }
  0x95   :  { %v133_v25 = vmul.f32 %v531_v21, %v132_v23  ;;  %536 = vpow2.f32 %v87_v53 }
  0x96   :  { %v181_v26 = vmul.f32 0.5, %v180_v24 }
  0x97   :  { %v134_v27 = vmul.f32 0.5, %v133_v25 }
  0x98   :  { %v182_v28 = vsub.f32 1.5, %v181_v26 }
  0x99   :  { %v533_v29 = vpop.eup %532  ;;  %v135_v30 = vsub.f32 1.5, %v134_v27  ;;  %v95_v27 = vlaneseq }
  0x9a   :  { %v535_v31 = vpop.eup %534  ;;  %v183_v32 = vmul.f32 %v529_v18, %v182_v28  ;;  %v195_v33 = vmul.f32 %v533_v29, %v193_v19  ;;  %vm201_vm7 = vweird.f32 %v533_v29 }
  0x9b   :  { %v136_v34 = vmul.f32 %v531_v21, %v135_v30  ;;  %v148_v35 = vmul.f32 %v535_v31, %v146_v20  ;;  %vm154_vm8 = vweird.f32 %v535_v31  ;;  %vm202_vm10 = vmor %vm200_vm9, %vm201_vm7  ;;  %v537_v62 = vpop.eup %536 }
  0x9c   :  { %v187_v36 = vsel %vm186_vm4, %v529_v18, %v183_v32  ;;  %v196_v37 = vmul.f32 %v533_v29, %v195_v33  ;;  %vm155_vm12 = vmor %vm153_vm11, %vm154_vm8 }
  0x9d   :  { %v188_v38 = vmul.f32 %v187_v36, %v173_v0  ;;  %v140_v39 = vsel %vm139_vm6, %v531_v21, %v136_v34  ;;  %v149_v40 = vmul.f32 %v535_v31, %v148_v35  ;;  %v786_v34 = vand.u32 127, %v95_v27 }
  0x9e   :  { %v141_v42 = vmul.f32 %v140_v39, %v126_v1  ;;  %v197_v43 = vmul.f32 0.5, %v196_v37  ;;  %v89_v1 = vsel %vm82_vm0, %v537_v62, 0.0  ;;  %v99_v37 = vpop.permute.xlu2 %98 }
  0x9f   :  { %v216_v44 = vpack.c.bf16 %v188_v38, %v188_v38  ;;  %v150_v45 = vmul.f32 0.5, %v149_v40  ;;  %90 = vadd.xlane.f32.xlu2 %v89_v1  ;;  %vm100_vm14 = vcmp.eq.s32.totalorder %v786_v34, %v99_v37  ;;  %vm403_vm2 = vcmp.ge.s32.totalorder %v786_v34, 8 }
  0xa0   :  { %v169_v46 = vpack.c.bf16 %v141_v42, %v141_v42  ;;  %v198_v47 = vsub.f32 1.5, %v197_v43  ;;  %vm455_vm7 = vcmp.eq.s32.totalorder %v786_v34, 0  ;;  %vm459_vm8 = vcmp.eq.s32.totalorder %v786_v34, 1 }
  0xa1   :  { %217 = vst [vmem:[#allocation2 + $0x4] sm:$0xf] %v216_v44  ;;  %v151_v49 = vsub.f32 1.5, %v150_v45  ;;  %v101_v45 = vsel %vm100_vm14, %v756_v4, 0.0  ;;  %vm463_vm9 = vcmp.eq.s32.totalorder %v786_v34, 2 }
  0xa2   :  { %170 = vst [vmem:[#allocation2] sm:$0xf] %v169_v46  ;;  %v199_v50 = vmul.f32 %v533_v29, %v198_v47 }
  0xa3   :  { %v152_v51 = vmul.f32 %v535_v31, %v151_v49 }
  0xa4   :  { %v203_v52 = vsel %vm202_vm10, %v533_v29, %v199_v50 }
  0xa5   :  { %v204_v54 = vmul.f32 %v203_v52, %v760_v6  ;;  %v156_v55 = vsel %vm155_vm12, %v535_v31, %v152_v51  ;;  %v102_v52 = vsel %vm82_vm0, %v101_v45, 0.0  ;;  %vm220_vm0 = vcmask 7168  }
  0xa6   :  { %v157_v56 = vmul.f32 %v156_v55, %v762_v7  ;;  %v701_v7 = vmov 1.0  }
  0xa7   :  { %v218_v57 = vpack.c.bf16 %v204_v54, %v204_v54  ;;  %v777_v58 = vmul.f32 %v204_v54, %v188_v38 }
  0xa8   :  { %v171_v59 = vpack.c.bf16 %v157_v56, %v157_v56  ;;  %v779_v60 = vmul.f32 %v157_v56, %v141_v42 }
  0xa9   :  { %219 = vst [vmem:[#allocation3 + $0x4] sm:$0xf] %v218_v57  ;;  %v500_v61 = vld [vmem:[#allocation2] sm:$0xff] }
  0xaa   :  { %172 = vst [vmem:[#allocation3] sm:$0xf] %v171_v59  ;;  %240 = vmatpush.bf16.xpose.msra.mxu0 %v500_v61  ;;  %v223_v29 = vld [vmem:[#allocation2] sm:$0xff]  }
  0xab   :  { %v299_v33 = vunpack.c.l.bf16 %v223_v29  ;;  %v300_v42 = vunpack.c.h.bf16 %v223_v29 }
  0xad   :  { %v303_v38 = vmul.f32 %v299_v33, %v299_v33  ;;  %v304_v49 = vmul.f32 %v300_v42, %v300_v42 }
  0xb1   :  { %v501_v63 = vld [vmem:[#allocation3] sm:$0xff]  ;;  %241 = vmatmul.bf16.vlgmr.msra.gmra.mxu0 %v500_v61 }
  0xb2   :  { %v226_v0 = vld [vmem:[#allocation3] sm:$0xff]   ;;  %266 = vmatpush.bf16.xpose.msra.mxu1 %v501_v63  ;;  %286 = vmatpush.bf16.xpose.msra.mxu2 %v501_v63 }
  0xb3   :  { %v302_v2 = vunpack.c.h.bf16 %v226_v0  ;;  %v301_v5 = vunpack.c.l.bf16 %v226_v0 }
  0xb5   :  { %v310_v3 = vmul.f32 %v302_v2, %v302_v2  ;;  %v309_v6 = vmul.f32 %v301_v5, %v301_v5 }
  0xb7   :  { %325 = vmatpush.xpose.msra.mxu3 %v310_v3 }
  0xb9   :  { %267 = vmatmul.bf16.vlgmr.msra.gmra.mxu1 %v500_v61  ;;  %287 = vmatmul.bf16.vlgmr.msra.gmra.mxu2 %v501_v63 }
  0xbb   :  { %326 = vmatpush.xpose.msra.mxu3 %v309_v6 }
  0xbe   :  { %327 = vmatmul.f32.vlgmr.msra.gmra.mxu3 %v701_v7  ;;  %v702_v7 = vmov 0.0  }
  0xbf   :  { %221 = vst.msk [vmem:[#allocation4] sm:$0xff] %vm220_vm0, %v702_v7 }
  0xc0   :  { %222 = vst.msk [vmem:[#allocation4 + $0x8] sm:$0xff] %vm220_vm0, %v702_v7 }
 0x12e   :  { %v242_v8 = vpop.f32.mrf.mxu0 }
 0x12f   :  { %v247_v9 = vmul.f32 2.0, %v242_v8 }
 0x131   :  { %v249_v10 = vmul.f32 1.442695, %v247_v9  ;;  %v91_v9 = vpop.xlane.xlu2 %90 }
 0x133   :  { %538 = vpow2.f32 %v249_v10 }
 0x136   :  { %v244_v11 = vpop.f32.mrf.mxu0  ;;  %v268_v12 = vpop.f32.mrf.mxu1 }
 0x137   :  { %v248_v13 = vmul.f32 2.0, %v244_v11  ;;  %v273_v14 = vmul.f32 2.0, %v268_v12  ;;  %v331_v11 = vld [vmem:[#allocation4] sm:$0xff] }
 0x139   :  { %v539_v15 = vpop.eup %538  ;;  %v251_v16 = vmul.f32 1.442695, %v248_v13  ;;  %v275_v17 = vmul.f32 1.442695, %v273_v14  ;;  %v332_v14 = vld [vmem:[#allocation4 + $0x8] sm:$0xff] }
 0x13a   :  { %v334_v18 = vsel %vm333_vm13, %v539_v15, 0.0 }
 0x13b   :  { %540 = vpow2.f32 %v251_v16  ;;  %335 = vadd.xlane.f32.xlu0 %v334_v18 }
 0x13c   :  { %542 = vpow2.f32 %v275_v17  ;;  %v288_v19 = vpop.f32.mrf.mxu2 }
 0x13d   :  { %v293_v22 = vmul.f32 2.0, %v288_v19 }
 0x13e   :  { %v270_v20 = vpop.f32.mrf.mxu1 }
 0x13f   :  { %v274_v21 = vmul.f32 2.0, %v270_v20  ;;  %v295_v30 = vmul.f32 1.442695, %v293_v22 }
 0x141   :  { %v541_v23 = vpop.eup %540  ;;  %v277_v24 = vmul.f32 1.442695, %v274_v21  ;;  %v328_v46 = vpop.f32.mrf.mxu3 }
 0x142   :  { %v543_v25 = vpop.eup %542  ;;  %v337_v26 = vsel %vm333_vm13, %v541_v23, 0.0  ;;  %v381_v53 = vmul.f32 2.0, %v328_v46 }
 0x143   :  { %544 = vpow2.f32 %v277_v24  ;;  %338 = vadd.xlane.f32.xlu1 %v337_v26  ;;  %v340_v28 = vsel %vm333_vm13, %v543_v25, 0.0 }
 0x144   :  { %341 = vadd.xlane.f32.xlu0 %v340_v28  ;;  %v290_v31 = vpop.f32.mrf.mxu2  ;;  %546 = vpow2.f32 %v295_v30  ;;  %v382_v57 = vmul.f32 1.442695, %v381_v53 }
 0x145   :  { %v294_v32 = vmul.f32 2.0, %v290_v31 }
 0x147   :  { %v297_v35 = vmul.f32 1.442695, %v294_v32 }
 0x149   :  { %v545_v36 = vpop.eup %544  ;;  %548 = vpow2.f32 %v297_v35 }
 0x14a   :  { %v343_v39 = vsel %vm333_vm13, %v545_v36, 0.0  ;;  %v547_v44 = vpop.eup %546  ;;  %550 = vpow2.f32 %v382_v57 }
 0x14b   :  { %344 = vadd.xlane.f32.xlu1 %v343_v39  ;;  %v364_v40 = vadd.f32 %v343_v39, %v340_v28  ;;  %v371_v50 = vsel %vm333_vm13, %v547_v44, 0.0  ;;  %552 = vlog2.f32 %v91_v9 }
 0x14c   :  { %305 = vadd.xlane.f32.xlu0 %v303_v38  ;;  %v499_v38 = vadd.s32 4294967288, %v786_v34 }
 0x14d   :  { %v365_v43 = vrot.slane %v364_v40, 4 }
 0x14e   :  { %v405_v42 = vsel %vm403_vm2, %v499_v38, %v786_v34 }
 0x14f   :  { %v366_v47 = vadd.f32 %v365_v43, %v364_v40  ;;  %v549_v48 = vpop.eup %548  ;;  %vm406_vm3 = vcmp.lt.s32.totalorder %v405_v42, 2 }
 0x150   :  { %v372_v51 = vsel %vm333_vm13, %v549_v48, 0.0  ;;  %v551_v3 = vpop.eup %550 }
 0x151   :  { %v373_v54 = vadd.f32 %v372_v51, %v371_v50  ;;  %v367_v55 = vrot.slane %v366_v47, 2  ;;  %v553_v16 = vpop.eup %552 }
 0x152   :  { %v93_v22 = vmul.f32 0.6931472, %v553_v16 }
 0x153   :  { %307 = vadd.xlane.f32.xlu1 %v304_v49  ;;  %v374_v56 = vrot.slane %v373_v54, 4  ;;  %v368_v61 = vadd.f32 %v367_v55, %v366_v47 }
 0x154   :  { %103 = vadd.xlane.f32.xlu0 %v102_v52  ;;  %v94_v26 = vadd.f32 %v93_v22, %v771_v41 }
 0x155   :  { %v375_v59 = vadd.f32 %v374_v56, %v373_v54  ;;  %v369_v63 = vrot.slane %v368_v61, 1  ;;  %v394_v54 = vshrl.u32 %v95_v27, 7 }
 0x157   :  { %v376_v4 = vrot.slane %v375_v59, 2  ;;  %v370_v2 = vadd.f32 %v369_v63, %v368_v61  ;;  %vm401_vm4 = vcmp.lt.s32.totalorder %v394_v54, 2  ;;  %v703_v63 = vmov 2.0  }
 0x159   :  { %v377_v62 = vadd.f32 %v376_v4, %v375_v59 }
 0x15b   :  { %v378_v0 = vrot.slane %v377_v62, 1 }
 0x15c   :  { %159 = vadd.xlane.f32.xlu0 %v779_v60 }
 0x15d   :  { %v379_v1 = vadd.f32 %v378_v0, %v377_v62 }
 0x15f   :  { %v380_v5 = vadd.f32 %v379_v1, %v370_v2 }
 0x161   :  { %v384_v6 = vsub.f32 %v380_v5, %v551_v3 }
 0x163   :  { %386 = vst.msk [vmem:[#allocation5] sm:$0x1] %vm385_vm15, %v384_v6 }
 0x16a   :  { %v391_v19 = vld [vmem:[#allocation5] sm:$0x1] }
 0x16b   :  { %v497_v24 = vadd.f32 -24.0, %v391_v19 }
 0x16d   :  { %v415_v28 = vmax.f32 %v497_v24, 1e-30 }
 0x1ae   :  { %v336_v8 = vpop.xlane.xlu0 %335 }
 0x1b6   :  { %v339_v10 = vpop.xlane.xlu1 %338 }
 0x1b7   :  { %v342_v12 = vpop.xlane.xlu0 %341 }
 0x1b8   :  { %v346_v60 = vadd.f32 %v342_v12, %v336_v8 }
 0x1ba   :  { %v348_v13 = vadd.f32 %v346_v60, %v331_v11 }
 0x1bc   :  { %350 = vst.msk [vmem:[#allocation4] sm:$0xff] %vm220_vm0, %v348_v13 }
 0x1be   :  { %v345_v15 = vpop.xlane.xlu1 %344 }
 0x1bf   :  { %v347_v17 = vadd.f32 %v345_v15, %v339_v10  ;;  %v306_v18 = vpop.xlane.xlu0 %305 }
 0x1c0   :  { %v354_v20 = vmul.f32 2.0, %v306_v18 }
 0x1c1   :  { %v349_v21 = vadd.f32 %v347_v17, %v332_v14 }
 0x1c2   :  { %v356_v23 = vmul.f32 1.442695, %v354_v20 }
 0x1c3   :  { %351 = vst.msk [vmem:[#allocation4 + $0x8] sm:$0xff] %vm220_vm0, %v349_v21  ;;  %v352_v35 = vld [vmem:[#allocation4] sm:$0xff] }
 0x1c4   :  { %554 = vpow2.f32 %v356_v23 }
 0x1c5   :  { %556 = vlog2.f32 %v415_v28 }
 0x1c6   :  { %v308_v25 = vpop.xlane.xlu1 %307 }
 0x1c7   :  { %v355_v29 = vmul.f32 2.0, %v308_v25  ;;  %v104_v30 = vpop.xlane.xlu0 %103 }
 0x1c8   :  { %v105_v31 = vsub.f32 %v94_v26, %v104_v30  ;;  %v704_v26 = vmov 8.0  }
 0x1c9   :  { %v358_v32 = vmul.f32 1.442695, %v355_v29 }
 0x1ca   :  { %v555_v33 = vpop.eup %554  ;;  %v107_v36 = vsel %vm106_vm1, %v105_v31, 0.0  ;;  %v353_v40 = vld [vmem:[#allocation4 + $0x8] sm:$0xff] }
 0x1cb   :  { %v360_v37 = vsub.f32 %v352_v35, %v555_v33  ;;  %558 = vpow2.f32 %v358_v32  ;;  %108 = vadd.xlane.f32.xlu1 %v107_v36  ;;  %v557_v41 = vpop.eup %556 }
 0x1cc   :  { %v417_v44 = vmul.f32 0.6931472, %v557_v41 }
 0x1cd   :  { %362 = vst.msk [vmem:[#allocation4] sm:$0xff] %vm220_vm0, %v360_v37 }
 0x1ce   :  { %v418_v47 = vsel %vm406_vm3, %v417_v44, 0.0 }
 0x1cf   :  { %v431_v49 = vsel %vm385_vm15, %v418_v47, 0.0  ;;  %v160_v0 = vpop.xlane.xlu0 %159 }
 0x1d0   :  { %v161_v2 = vrot.slane %v160_v0, 4 }
 0x1d1   :  { %v559_v39 = vpop.eup %558 }
 0x1d2   :  { %v361_v43 = vsub.f32 %v353_v40, %v559_v39  ;;  %v162_v27 = vadd.f32 %v161_v2, %v160_v0 }
 0x1d3   :  { %206 = vadd.xlane.f32.xlu1 %v777_v58 }
 0x1d4   :  { %363 = vst.msk [vmem:[#allocation4 + $0x8] sm:$0xff] %vm220_vm0, %v361_v43  ;;  %v387_v45 = vld [vmem:[#allocation4] sm:$0xff]  ;;  %v163_v7 = vrot.slane %v162_v27, 2 }
 0x1d5   :  { %v495_v46 = vadd.f32 -24.0, %v387_v45 }
 0x1d6   :  { %v164_v12 = vadd.f32 %v163_v7, %v162_v27 }
 0x1d7   :  { %v407_v48 = vmax.f32 %v495_v46, 1e-30 }
 0x1d8   :  { %v165_v17 = vrot.slane %v164_v12, 1 }
 0x1d9   :  { %560 = vlog2.f32 %v407_v48 }
 0x1da   :  { %v166_v22 = vadd.f32 %v165_v17, %v164_v12 }
 0x1db   :  { %432 = vadd.xlane.f32.xlu1 %v431_v49  ;;  %v388_v50 = vld [vmem:[#allocation4 + $0x8] sm:$0xff] }
 0x1dc   :  { %v496_v51 = vadd.f32 -24.0, %v388_v50 }
 0x1de   :  { %v408_v52 = vmax.f32 %v496_v51, 1e-30 }
 0x1df   :  { %v561_v53 = vpop.eup %560 }
 0x1e0   :  { %562 = vlog2.f32 %v408_v52  ;;  %v410_v58 = vmul.f32 0.6931472, %v561_v53 }
 0x1e1   :  { %564 = vrcp.f32 %v703_v63 }
 0x1e2   :  { %v413_v57 = vsel %vm401_vm4, %v410_v58, 0.0  ;;  %566 = vrcp.f32 %v704_v26 }
 0x1e3   :  { %v419_v61 = vsel %vm220_vm0, %v413_v57, 0.0 }
 0x1e6   :  { %v563_v55 = vpop.eup %562 }
 0x1e7   :  { %v412_v56 = vmul.f32 0.6931472, %v563_v55  ;;  %v565_v1 = vpop.eup %564 }
 0x1e8   :  { %v118_v3 = vmul.f32 2.0, %v565_v1  ;;  %vm122_vm5 = vweird.f32 %v565_v1  ;;  %v567_v30 = vpop.eup %566 }
 0x1e9   :  { %v414_v59 = vsel %vm401_vm4, %v412_v56, 0.0  ;;  %v446_v32 = vmul.f32 8.0, %v567_v30  ;;  %vm450_vm6 = vweird.f32 %v567_v30 }
 0x1ea   :  { %v420_v4 = vsel %vm220_vm0, %v414_v59, 0.0  ;;  %v119_v5 = vsub.f32 1.0, %v118_v3 }
 0x1eb   :  { %v421_v62 = vadd.f32 %v420_v4, %v419_v61  ;;  %v447_v36 = vsub.f32 1.0, %v446_v32 }
 0x1ec   :  { %v120_v10 = vmul.f32 %v565_v1, %v119_v5 }
 0x1ed   :  { %422 = vadd.xlane.f32.xlu0 %v421_v62  ;;  %v448_v39 = vmul.f32 %v567_v30, %v447_v36 }
 0x1ee   :  { %v121_v13 = vadd.f32 %v565_v1, %v120_v10 }
 0x1ef   :  { %v449_v44 = vadd.f32 %v567_v30, %v448_v39 }
 0x1f0   :  { %v123_v20 = vsel %vm122_vm5, %v565_v1, %v121_v13 }
 0x1f1   :  { %v451_v48 = vsel %vm450_vm6, %v567_v30, %v449_v44 }
 0x23e   :  { %v109_v6 = vpop.xlane.xlu1 %108 }
 0x23f   :  { %v110_v8 = vrot.slane %v109_v6, 4 }
 0x241   :  { %v111_v9 = vadd.f32 %v110_v8, %v109_v6 }
 0x243   :  { %v112_v11 = vrot.slane %v111_v9, 2 }
 0x245   :  { %v113_v60 = vadd.f32 %v112_v11, %v111_v9 }
 0x246   :  { %v207_v14 = vpop.xlane.xlu1 %206 }
 0x247   :  { %v208_v15 = vrot.slane %v207_v14, 4  ;;  %v114_v16 = vrot.slane %v113_v60, 1 }
 0x249   :  { %v209_v18 = vadd.f32 %v208_v15, %v207_v14  ;;  %v115_v19 = vadd.f32 %v114_v16, %v113_v60 }
 0x24b   :  { %v210_v21 = vrot.slane %v209_v18, 2  ;;  %502 = vpush %v115_v19 }
 0x24c   :  { %504 = vpush %v123_v20 }
 0x24d   :  { %506 = vpush %v166_v22  ;;  %v211_v23 = vadd.f32 %v210_v21, %v209_v18 }
 0x24e   :  { %v433_v28 = vpop.xlane.xlu1 %432 }
 0x24f   :  { %v212_v24 = vrot.slane %v211_v23, 1  ;;  %v434_v29 = vrot.slane %v433_v28, 4 }
 0x251   :  { %v213_v25 = vadd.f32 %v212_v24, %v211_v23  ;;  %v435_v31 = vadd.f32 %v434_v29, %v433_v28 }
 0x253   :  { %508 = vpush %v213_v25  ;;  %v436_v33 = vrot.slane %v435_v31, 2 }
 0x255   :  { %v437_v41 = vadd.f32 %v436_v33, %v435_v31 }
 0x257   :  { %v438_v43 = vrot.slane %v437_v41, 1 }
 0x259   :  { %v439_v47 = vadd.f32 %v438_v43, %v437_v41 }
 0x260   :  { %v423_v35 = vpop.xlane.xlu0 %422 }
 0x261   :  { %v424_v37 = vrot.slane %v423_v35, 4 }
 0x263   :  { %v425_v38 = vadd.f32 %v424_v37, %v423_v35 }
 0x265   :  { %v426_v40 = vrot.slane %v425_v38, 2 }
 0x267   :  { %v427_v42 = vadd.f32 %v426_v40, %v425_v38 }
 0x269   :  { %v428_v45 = vrot.slane %v427_v42, 1 }
 0x26b   :  { %v429_v46 = vadd.f32 %v428_v45, %v427_v42 }
 0x26d   :  { %510 = vpush %v429_v46 }
 0x26e   :  { %512 = vpush %v439_v47 }
 0x26f   :  { %514 = vpush %v451_v48 }
 0x27c   :  { %s503_s5 = spop %502 }
 0x27d   :  { %s505_s16 = spop %504 }
 0x27e   :  { %s507_s17 = spop %506  ;;  %s125_s22 = smul.f32 %s505_s16, %s503_s5 }
 0x280   :  { %v456_v49 = vstv %s125_s22 }
 0x281   :  { %v457_v51 = vsel %vm455_vm7, %v456_v49, 0.0 }
 0x284   :  { %s509_s18 = spop %508 }
 0x285   :  { %s215_s19 = sadd.f32 %s509_s18, %s507_s17 }
 0x287   :  { %s442_s20 = smul.f32 2.0, %s215_s19 }
 0x289   :  { %s443_s24 = smul.f32 2.0, %s442_s20 }
 0x29e   :  { %s511_s21 = spop %510 }
 0x29f   :  { %s513_s23 = spop %512 }
 0x2a0   :  { %s441_s25 = sadd.f32 %s513_s23, %s511_s21  ;;  %s515_s26 = spop %514 }
 0x2a2   :  { %s444_s27 = ssub.f32 %s441_s25, %s443_s24 }
 0x2a4   :  { %s453_s28 = smul.f32 %s515_s26, %s444_s27 }
 0x2a6   :  { %s454_s29 = sadd.f32 %s453_s28, %s125_s22  ;;  %v460_v50 = vstv %s453_s28 }
 0x2a7   :  { %v461_v52 = vsel %vm459_vm8, %v460_v50, 0.0 }
 0x2a8   :  { %v462_v53 = vadd.f32 %v461_v52, %v457_v51  ;;  %v464_v54 = vstv %s454_s29 }
 0x2a9   :  { %v465_v58 = vsel %vm463_vm9, %v464_v54, 0.0 }
 0x2aa   :  { %v466_v55 = vadd.f32 %v465_v58, %v462_v53 }
 0x2ac   :  { %467 = vst [vmem:[#allocation14] sm:$0x1] %v466_v55 }
 0x2ad   :  { %478 = dma.vmem_to_hbm [thread:$0]  %s474_s7, 16, %s476_s1, [#allocation8]  }
 0x2ae   :  { %694 = dma.done.wait [#allocation8], 16  }
 0x2af   :  { %695 = vsyncadd [#allocation8], 4294967280 }
 0x2b0   :  { %483 = vsyncpa [#allocation7], 1 }
 0x2b1   :  { %484 = vsyncpa [#allocation10], 1 }
 0x2b2   :  { %485 = vsyncpa [#allocation13], 1 }
 0x2b3   :  { %486 = vsyncpa [#allocation8], 1 }

</bundles_post_ra>
